<compile_context>
chip_gen: v5e
topology: v5e:2x2
jax: 0.10.0
libtpu: 0.0.40
codegen_flags: <defaults>
</compile_context>

<pallas_src>
import jax
import jax.numpy as jnp
from jax.experimental import pallas as pl
from jax.experimental.pallas import tpu as pltpu

_SLOPE = 0.1


def _leaky_relu(v):
    return jnp.where(v >= 0, v, _SLOPE * v)


def sarsa_kernel(x_ref,
                 w1_ref, b1_ref,
                 w2_ref, b2_ref,
                 w3_ref, b3_ref,
                 w4_ref, b4_ref,
                 o_ref):
    # Batch sits on the lane (last) axis; features on sublanes.
    x = x_ref[...]                                            # [10, TB]
    h1 = _leaky_relu(
        jnp.dot(w1_ref[...], x, preferred_element_type=jnp.float32)
        + b1_ref[...])                                        # [20, TB]
    h2 = _leaky_relu(
        jnp.dot(w2_ref[...], h1, preferred_element_type=jnp.float32)
        + b2_ref[...])                                        # [50, TB]
    h3 = _leaky_relu(
        jnp.dot(w3_ref[...], h2, preferred_element_type=jnp.float32)
        + b3_ref[...])                                        # [30, TB]
    out = (jnp.dot(w4_ref[...], h3, preferred_element_type=jnp.float32)
           + b4_ref[...])                                     # [1, TB]
    o_ref[...] = out.astype(o_ref.dtype)


def sarsa_net_forward(x, params, *, batch_tile=1024):
    """x: [B, 10] float32; params: dict of PyTorch-shaped weights/biases."""
    B = x.shape[0]

    # Batch lives on the lane axis -> tile must be a multiple of 128.
    tb = max(128, min(batch_tile, pl.cdiv(B, 128) * 128))
    tb = pl.cdiv(tb, 128) * 128
    b_pad = pl.cdiv(B, tb) * tb

    # Batch-on-lanes layout: x -> [10, B_pad]; weights stay [out, in];
    # biases -> [out, 1] columns (broadcast over lanes).
    x_t = jnp.transpose(x)
    if b_pad != B:
        x_t = jnp.pad(x_t, ((0, 0), (0, b_pad - B)))

    w1, w2, w3, w4 = params["w1"], params["w2"], params["w3"], params["w4"]
    b1 = params["b1"][:, None]
    b2 = params["b2"][:, None]
    b3 = params["b3"][:, None]
    b4 = params["b4"][:, None]

    # Weights/biases: full-extent blocks with a constant index_map so they stay
    # VMEM-resident across the whole batch grid (no per-step re-DMA).
    resident = lambda a: pl.BlockSpec(a.shape, lambda i: (0, 0))

    out_t = pl.pallas_call(
        sarsa_kernel,
        out_shape=jax.ShapeDtypeStruct((1, b_pad), jnp.float32),
        grid_spec=pltpu.PrefetchScalarGridSpec(
            num_scalar_prefetch=0,
            grid=(b_pad // tb,),
            in_specs=[pl.BlockSpec((10, tb), lambda i: (0, i)),
                      resident(w1), resident(b1),
                      resident(w2), resident(b2),
                      resident(w3), resident(b3),
                      resident(w4), resident(b4)],
            out_specs=pl.BlockSpec((1, tb), lambda i: (0, i)),
        ),
        compiler_params=pltpu.CompilerParams(
            # Batch tiles are independent -> shard across TensorCores on v7x.
            dimension_semantics=("parallel",),
        ),
    )(x_t, w1, b1, w2, b2, w3, b3, w4, b4)

    # [1, B_pad] -> [B, 1]
    return jnp.transpose(out_t[:, :B])


def init_params(key):
    """Deterministic init mimicking PyTorch Linear default (U[-1/sqrt(in), 1/sqrt(in)])."""
    dims = [(20, 10), (50, 20), (30, 50), (1, 30)]
    params = {}
    for i, (out_f, in_f) in enumerate(dims, start=1):
        key, kw, kb = jax.random.split(key, 3)
        bound = 1.0 / jnp.sqrt(float(in_f))
        params[f"w{i}"] = jax.random.uniform(
            kw, (out_f, in_f), jnp.float32, minval=-bound, maxval=bound)
        params[f"b{i}"] = jax.random.uniform(
            kb, (out_f,), jnp.float32, minval=-bound, maxval=bound)
    return params


def reference_forward(x, params):
    """Pure-JAX reference matching the PyTorch forward exactly."""
    def lrelu(v):
        return jnp.where(v >= 0, v, 0.1 * v)
    h = lrelu(x @ params["w1"].T + params["b1"])
    h = lrelu(h @ params["w2"].T + params["b2"])
    h = lrelu(h @ params["w3"].T + params["b3"])
    return h @ params["w4"].T + params["b4"]


if __name__ == "__main__":
    key = jax.random.PRNGKey(0)
    key, kx = jax.random.split(key)
    B = 8
    x = jax.random.normal(kx, (B, 10), jnp.float32)
    params = init_params(key)

    out = sarsa_net_forward(x, params)
    out = jax.block_until_ready(out)

    ref = reference_forward(x, params)
    assert out.shape == (B, 1), out.shape
    assert jnp.allclose(out, ref, atol=1e-4, rtol=1e-5), (out, ref)
    print("KERNEL_OK")
</pallas_src>

<mosaic_0001>
module attributes {stable_mosaic.version = 11 : i64} {
  func.func @sarsa_kernel(%arg0: i32, %arg1: memref<10x128xf32, #tpu.memory_space<vmem>>, %arg2: memref<20x10xf32, #tpu.memory_space<vmem>>, %arg3: memref<20x1xf32, #tpu.memory_space<vmem>>, %arg4: memref<50x20xf32, #tpu.memory_space<vmem>>, %arg5: memref<50x1xf32, #tpu.memory_space<vmem>>, %arg6: memref<30x50xf32, #tpu.memory_space<vmem>>, %arg7: memref<30x1xf32, #tpu.memory_space<vmem>>, %arg8: memref<1x30xf32, #tpu.memory_space<vmem>>, %arg9: memref<1x1xf32, #tpu.memory_space<vmem>>, %arg10: memref<1x128xf32, #tpu.memory_space<vmem>>) attributes {dimension_semantics = [#tpu.dimension_semantics<parallel>], iteration_bounds = array<i64: 1>, scalar_prefetch = 0 : i64, scratch_operands = 0 : i64, tpu.core_type = #tpu.core_type<tc>, window_params = [{transform_indices = @transform_0, window_bounds = array<i64: 10, 128>}, {pipeline_mode = #tpu.pipeline_mode<synchronous>, transform_indices = @transform_1, window_bounds = array<i64: 20, 10>}, {pipeline_mode = #tpu.pipeline_mode<synchronous>, transform_indices = @transform_2, window_bounds = array<i64: 20, 1>}, {pipeline_mode = #tpu.pipeline_mode<synchronous>, transform_indices = @transform_3, window_bounds = array<i64: 50, 20>}, {pipeline_mode = #tpu.pipeline_mode<synchronous>, transform_indices = @transform_4, window_bounds = array<i64: 50, 1>}, {pipeline_mode = #tpu.pipeline_mode<synchronous>, transform_indices = @transform_5, window_bounds = array<i64: 30, 50>}, {pipeline_mode = #tpu.pipeline_mode<synchronous>, transform_indices = @transform_6, window_bounds = array<i64: 30, 1>}, {pipeline_mode = #tpu.pipeline_mode<synchronous>, transform_indices = @transform_7, window_bounds = array<i64: 1, 30>}, {pipeline_mode = #tpu.pipeline_mode<synchronous>, transform_indices = @transform_8, window_bounds = array<i64: 1, 1>}, {transform_indices = @transform_9, window_bounds = array<i64: 1, 128>}]} {
    %c0 = arith.constant 0 : index
    %c0_0 = arith.constant 0 : index
    %0 = vector.load %arg1[%c0, %c0_0] : memref<10x128xf32, #tpu.memory_space<vmem>>, vector<10x128xf32>
    %c0_1 = arith.constant 0 : index
    %c0_2 = arith.constant 0 : index
    %1 = vector.load %arg2[%c0_1, %c0_2] : memref<20x10xf32, #tpu.memory_space<vmem>>, vector<20x10xf32>
    %cst = arith.constant dense<0.000000e+00> : vector<20x128xf32>
    %2 = tpu.matmul %1, %0, %cst {dimension_numbers = #tpu.dot_dimension_numbers<[1], [0], [0], [1], [0, 0, 1, 1], [], []>} : vector<20x10xf32>, vector<10x128xf32>, vector<20x128xf32> -> vector<20x128xf32>
    %c0_3 = arith.constant 0 : index
    %c0_4 = arith.constant 0 : index
    %3 = vector.load %arg3[%c0_3, %c0_4] : memref<20x1xf32, #tpu.memory_space<vmem>>, vector<20x1xf32>
    %4 = vector.broadcast %3 : vector<20x1xf32> to vector<20x128xf32>
    %5 = arith.addf %2, %4 : vector<20x128xf32>
    %cst_5 = arith.constant 0.000000e+00 : f32
    %6 = vector.broadcast %cst_5 : f32 to vector<20x128xf32>
    %7 = arith.cmpf oge, %5, %6 : vector<20x128xf32>
    %cst_6 = arith.constant 1.000000e-01 : f32
    %8 = vector.broadcast %cst_6 : f32 to vector<20x128xf32>
    %9 = arith.mulf %8, %5 : vector<20x128xf32>
    %10 = arith.select %7, %5, %9 : vector<20x128xi1>, vector<20x128xf32>
    %c0_7 = arith.constant 0 : index
    %c0_8 = arith.constant 0 : index
    %11 = vector.load %arg4[%c0_7, %c0_8] : memref<50x20xf32, #tpu.memory_space<vmem>>, vector<50x20xf32>
    %cst_9 = arith.constant dense<0.000000e+00> : vector<50x128xf32>
    %12 = tpu.matmul %11, %10, %cst_9 {dimension_numbers = #tpu.dot_dimension_numbers<[1], [0], [0], [1], [0, 0, 1, 1], [], []>} : vector<50x20xf32>, vector<20x128xf32>, vector<50x128xf32> -> vector<50x128xf32>
    %c0_10 = arith.constant 0 : index
    %c0_11 = arith.constant 0 : index
    %13 = vector.load %arg5[%c0_10, %c0_11] : memref<50x1xf32, #tpu.memory_space<vmem>>, vector<50x1xf32>
    %14 = vector.broadcast %13 : vector<50x1xf32> to vector<50x128xf32>
    %15 = arith.addf %12, %14 : vector<50x128xf32>
    %cst_12 = arith.constant 0.000000e+00 : f32
    %16 = vector.broadcast %cst_12 : f32 to vector<50x128xf32>
    %17 = arith.cmpf oge, %15, %16 : vector<50x128xf32>
    %cst_13 = arith.constant 1.000000e-01 : f32
    %18 = vector.broadcast %cst_13 : f32 to vector<50x128xf32>
    %19 = arith.mulf %18, %15 : vector<50x128xf32>
    %20 = arith.select %17, %15, %19 : vector<50x128xi1>, vector<50x128xf32>
    %c0_14 = arith.constant 0 : index
    %c0_15 = arith.constant 0 : index
    %21 = vector.load %arg6[%c0_14, %c0_15] : memref<30x50xf32, #tpu.memory_space<vmem>>, vector<30x50xf32>
    %cst_16 = arith.constant dense<0.000000e+00> : vector<30x128xf32>
    %22 = tpu.matmul %21, %20, %cst_16 {dimension_numbers = #tpu.dot_dimension_numbers<[1], [0], [0], [1], [0, 0, 1, 1], [], []>} : vector<30x50xf32>, vector<50x128xf32>, vector<30x128xf32> -> vector<30x128xf32>
    %c0_17 = arith.constant 0 : index
    %c0_18 = arith.constant 0 : index
    %23 = vector.load %arg7[%c0_17, %c0_18] : memref<30x1xf32, #tpu.memory_space<vmem>>, vector<30x1xf32>
    %24 = vector.broadcast %23 : vector<30x1xf32> to vector<30x128xf32>
    %25 = arith.addf %22, %24 : vector<30x128xf32>
    %cst_19 = arith.constant 0.000000e+00 : f32
    %26 = vector.broadcast %cst_19 : f32 to vector<30x128xf32>
    %27 = arith.cmpf oge, %25, %26 : vector<30x128xf32>
    %cst_20 = arith.constant 1.000000e-01 : f32
    %28 = vector.broadcast %cst_20 : f32 to vector<30x128xf32>
    %29 = arith.mulf %28, %25 : vector<30x128xf32>
    %30 = arith.select %27, %25, %29 : vector<30x128xi1>, vector<30x128xf32>
    %c0_21 = arith.constant 0 : index
    %c0_22 = arith.constant 0 : index
    %31 = vector.load %arg8[%c0_21, %c0_22] : memref<1x30xf32, #tpu.memory_space<vmem>>, vector<1x30xf32>
    %cst_23 = arith.constant dense<0.000000e+00> : vector<1x128xf32>
    %32 = tpu.matmul %31, %30, %cst_23 {dimension_numbers = #tpu.dot_dimension_numbers<[1], [0], [0], [1], [0, 0, 1, 1], [], []>} : vector<1x30xf32>, vector<30x128xf32>, vector<1x128xf32> -> vector<1x128xf32>
    %c0_24 = arith.constant 0 : index
    %c0_25 = arith.constant 0 : index
    %33 = vector.load %arg9[%c0_24, %c0_25] : memref<1x1xf32, #tpu.memory_space<vmem>>, vector<1x1xf32>
    %34 = vector.broadcast %33 : vector<1x1xf32> to vector<1x128xf32>
    %35 = arith.addf %32, %34 : vector<1x128xf32>
    %c0_26 = arith.constant 0 : index
    %c0_27 = arith.constant 0 : index
    %36 = vector.load %arg10[%c0_26, %c0_27] : memref<1x128xf32, #tpu.memory_space<vmem>>, vector<1x128xf32>
    tpu.vector_store %arg10[%c0_26, %c0_27], %35 {strides = array<i32>} : memref<1x128xf32, #tpu.memory_space<vmem>>, vector<1x128xf32>,
    return
  }
  func.func @transform_0(%arg0: i32) -> (i32, i32) {
    %c0_i32 = arith.constant 0 : i32
    %c0_i32_0 = arith.constant 0 : i32
    return %c0_i32, %arg0 : i32, i32
  }
  func.func @transform_1(%arg0: i32) -> (i32, i32) {
    %c0_i32 = arith.constant 0 : i32
    %c0_i32_0 = arith.constant 0 : i32
    %c0_i32_1 = arith.constant 0 : i32
    return %c0_i32, %c0_i32_0 : i32, i32
  }
  func.func @transform_2(%arg0: i32) -> (i32, i32) {
    %c0_i32 = arith.constant 0 : i32
    %c0_i32_0 = arith.constant 0 : i32
    %c0_i32_1 = arith.constant 0 : i32
    return %c0_i32, %c0_i32_0 : i32, i32
  }
  func.func @transform_3(%arg0: i32) -> (i32, i32) {
    %c0_i32 = arith.constant 0 : i32
    %c0_i32_0 = arith.constant 0 : i32
    %c0_i32_1 = arith.constant 0 : i32
    return %c0_i32, %c0_i32_0 : i32, i32
  }
  func.func @transform_4(%arg0: i32) -> (i32, i32) {
    %c0_i32 = arith.constant 0 : i32
    %c0_i32_0 = arith.constant 0 : i32
    %c0_i32_1 = arith.constant 0 : i32
    return %c0_i32, %c0_i32_0 : i32, i32
  }
  func.func @transform_5(%arg0: i32) -> (i32, i32) {
    %c0_i32 = arith.constant 0 : i32
    %c0_i32_0 = arith.constant 0 : i32
    %c0_i32_1 = arith.constant 0 : i32
    return %c0_i32, %c0_i32_0 : i32, i32
  }
  func.func @transform_6(%arg0: i32) -> (i32, i32) {
    %c0_i32 = arith.constant 0 : i32
    %c0_i32_0 = arith.constant 0 : i32
    %c0_i32_1 = arith.constant 0 : i32
    return %c0_i32, %c0_i32_0 : i32, i32
  }
  func.func @transform_7(%arg0: i32) -> (i32, i32) {
    %c0_i32 = arith.constant 0 : i32
    %c0_i32_0 = arith.constant 0 : i32
    %c0_i32_1 = arith.constant 0 : i32
    return %c0_i32, %c0_i32_0 : i32, i32
  }
  func.func @transform_8(%arg0: i32) -> (i32, i32) {
    %c0_i32 = arith.constant 0 : i32
    %c0_i32_0 = arith.constant 0 : i32
    %c0_i32_1 = arith.constant 0 : i32
    return %c0_i32, %c0_i32_0 : i32, i32
  }
  func.func @transform_9(%arg0: i32) -> (i32, i32) {
    %c0_i32 = arith.constant 0 : i32
    %c0_i32_0 = arith.constant 0 : i32
    return %c0_i32, %arg0 : i32, i32
  }
}

</mosaic_0001>

<bundles_post_ra>
// kernel: tpu_custom_call.1
= control target key start
LH: loop header
LB: loop body
LE: loop exit
PB: predicated region body
PF: predicated region fallthrough
CT: control target
= control target key end

     0   :  { %s603_s0 = inlined_call_operand.vmem [shape: f32[10,128], index: 0, kind: input, shape index: {}]   ;;  %s604_s1 = inlined_call_operand.vmem [shape: f32[20,10], index: 1, kind: input, shape index: {}]   ;;  %s605_s2 = inlined_call_operand.vmem [shape: f32[20,1], index: 2, kind: input, shape index: {}]   ;;  %s606_s3 = inlined_call_operand.vmem [shape: f32[50,20], index: 3, kind: input, shape index: {}]   ;;  %s607_s4 = inlined_call_operand.vmem [shape: f32[50,1], index: 4, kind: input, shape index: {}]   ;;  %s608_s5 = inlined_call_operand.vmem [shape: f32[30,50], index: 5, kind: input, shape index: {}]   ;;  %s609_s6 = inlined_call_operand.vmem [shape: f32[30,1], index: 6, kind: input, shape index: {}]   ;;  %s610_s7 = inlined_call_operand.vmem [shape: f32[1,30], index: 7, kind: input, shape index: {}]   ;;  %s611_s8 = inlined_call_operand.<no memory space> [shape: f32[1,1], index: 8, kind: input, shape index: {}]   ;;  %s612_s9 = inlined_call_operand.hbm [shape: f32[1,128], index: 9, kind: output, shape index: {}]  }
   0x1   :  { %v14_v0 = vstv %s611_s8 }
   0x2   :  { %15 = vst [vmem:[#allocation2] sm:$0x1] %v14_v0 }
   0x3   :  { %v36_v1 = vld [vmem:[%s603_s0 + $0x8] sm:$0x3]  ;;  %vm68_vm0 = vcmask 1041408   ;;  %v42_v2 = vld [vmem:[%s605_s2 + $0x10] sm:$0xf]  ;;  %v439_v3 = vmov 0  }
   0x4   :  { %410 = vset.pattern.permute.xlu0 %v439_v3  ;;  %379 = vmatpush.msk.msra.mxu0 %vm68_vm0, %v36_v1  ;;  %v40_v4 = vld [vmem:[%s605_s2] sm:$0xff]  ;;  %vm58_vm1 = vcmask 80896  }
   0x5   :  { %v35_v5 = vld [vmem:[%s603_s0] sm:$0xff]  ;;  %411 = vset.pattern.permute.xlu1 %v439_v3  ;;  %55 = vperm.xlu0 %410, %v42_v2  }
   0x6   :  { %v37_v6 = vld [vmem:[%s604_s1] sm:$0xff]  ;;  %45 = vperm.xlu1 %411, %v40_v4   ;;  %87 = vmatpush.msra.mxu0 %v35_v5 }
   0x7   :  { %380 = vmatmul.msk.f32.vlgmr.msra.gmra.mxu0 %vm58_vm1, %v37_v6  ;;  %412 = vset.pattern.permute.xlu2 %v439_v3 }
   0x8   :  { %16 = vsyncpa [#allocation4], 0  ;;  %v41_v7 = vld [vmem:[%s605_s2 + $0x8] sm:$0xff]  ;;  %v120_v8 = vld [vmem:[%s607_s4 + $0x30] sm:$0x3]  ;;  %vm178_vm2 = vcmask 1043456  }
   0x9   :  { %v38_v9 = vld [vmem:[%s604_s1 + $0x8] sm:$0xff]  ;;  %v117_v10 = vld [vmem:[%s607_s4 + $0x18] sm:$0xff]  ;;  %v116_v11 = vld [vmem:[%s607_s4 + $0x10] sm:$0xff]  ;;  %vm156_vm6 = vcmask 162816   ;;  %vm269_vm14 = vcmask 408576   ;;  %vm338_vm15 = vcmask 1045504  }
   0xa   :  { %v39_v12 = vld [vmem:[%s604_s1 + $0x10] sm:$0xf]  ;;  %v114_v13 = vld [vmem:[%s607_s4] sm:$0xff]  ;;  %v248_v14 = vld [vmem:[%s609_s6 + $0x18] sm:$0x3f]  ;;  %s440_s18 = smov [#allocation3]  }
   0xb   :  { %v246_v15 = vld [vmem:[%s609_s6 + $0x8] sm:$0xff]  ;;  %v245_v16 = vld [vmem:[%s609_s6] sm:$0xff]  ;;  %v247_v39 = vld [vmem:[%s609_s6 + $0x10] sm:$0xff]  ;;  %s368_s19 = sshll.u32 %s440_s18, 4  ;;  %s370_s22 = sshll.u32 %s612_s9, 4  ;;  %s369_s19 = int_to_ptr.vmem [resolvable:$true] %s368_s19  ;;  %s371_s22 = int_to_ptr.hbm [resolvable:$true] %s370_s22 }
   0xc   :  { %v119_v20 = vld [vmem:[%s607_s4 + $0x28] sm:$0xff]  ;;  %v118_v29 = vld [vmem:[%s607_s4 + $0x20] sm:$0xff]  ;;  %v109_v40 = vld [vmem:[%s606_s3 + $0x10] sm:$0xff] }
   0xd   :  { %50 = vperm.xlu0 %410, %v41_v7   ;;  %148 = vperm.xlu2 %412, %v119_v20   ;;  %v107_v33 = vld [vmem:[%s606_s3] sm:$0xff]  ;;  %v115_v36 = vld [vmem:[%s607_s4 + $0x8] sm:$0xff]  ;;  %v113_v41 = vld [vmem:[%s606_s3 + $0x30] sm:$0x3] }
   0xe   :  { %153 = vperm.xlu1 %411, %v120_v8   ;;  %v111_v34 = vld [vmem:[%s606_s3 + $0x20] sm:$0xff]  ;;  %v108_v37 = vld [vmem:[%s606_s3 + $0x8] sm:$0xff]  ;;  %v110_v43 = vld [vmem:[%s606_s3 + $0x18] sm:$0xff] }
   0xf   :  { %381 = vmatmul.msk.f32.gmra.mxu0 %vm58_vm1, %v38_v9  ;;  %v112_v38 = vld [vmem:[%s606_s3 + $0x28] sm:$0xff]  ;;  %v327_v42 = vld [vmem:[#allocation2] sm:$0x1] }
  0x15   :  { %138 = vperm.xlu0 %410, %v117_v10   ;;  %143 = vperm.xlu2 %412, %v118_v29  }
  0x16   :  { %133 = vperm.xlu1 %411, %v116_v11  }
  0x17   :  { %382 = vmatmul.msk.f32.gmra.mxu0 %vm58_vm1, %v39_v12 }
  0x1d   :  { %123 = vperm.xlu0 %410, %v114_v13   ;;  %128 = vperm.xlu2 %412, %v115_v36  }
  0x1e   :  { %266 = vperm.xlu1 %411, %v248_v14   ;;  %v241_v14 = vld [vmem:[%s608_s5] sm:$0xff] }
  0x25   :  { %256 = vperm.xlu0 %410, %v246_v15   ;;  %261 = vperm.xlu2 %412, %v247_v39   ;;  %v242_v15 = vld [vmem:[%s608_s5 + $0x8] sm:$0xff] }
  0x26   :  { %251 = vperm.xlu1 %411, %v245_v16  }
  0x2d   :  { %330 = vperm.xlu2 %412, %v327_v42  }
  0x67   :  { %v149_v46 = vpop.permute.xlu2 %148 }
  0x6f   :  { %v144_v51 = vpop.permute.xlu2 %143 }
  0x77   :  { %v56_v18 = vpop.permute.xlu0 %55  ;;  %v129_v1 = vpop.permute.xlu2 %128 }
  0x78   :  { %v46_v23 = vpop.permute.xlu1 %45 }
  0x7f   :  { %v51_v21 = vpop.permute.xlu0 %50 }
  0x80   :  { %v154_v49 = vpop.permute.xlu1 %153 }
  0x84   :  { %v89_v17 = vpop.f32.mrf.mxu0 }
  0x85   :  { %v90_v25 = vadd.f32 %v89_v17, %v46_v23  ;;  %v243_v17 = vld [vmem:[%s608_s5 + $0x10] sm:$0xff] }
  0x87   :  { %v101_v31 = vmul.f32 0.1, %v90_v25  ;;  %vm98_vm5 = vcmp.ge.f32.partialorder %v90_v25, 0.0  ;;  %v139_v52 = vpop.permute.xlu0 %138 }
  0x88   :  { %v134_v61 = vpop.permute.xlu1 %133 }
  0x89   :  { %v104_v35 = vsel %vm98_vm5, %v90_v25, %v101_v31 }
  0x8c   :  { %v92_v19 = vpop.f32.mrf.mxu0 }
  0x8d   :  { %v93_v22 = vadd.f32 %v92_v19, %v51_v21 }
  0x8f   :  { %v102_v28 = vmul.f32 0.1, %v93_v22  ;;  %vm99_vm4 = vcmp.ge.f32.partialorder %v93_v22, 0.0  ;;  %v124_v5 = vpop.permute.xlu0 %123 }
  0x90   :  { %v267_v20 = vpop.permute.xlu1 %266 }
  0x91   :  { %v105_v32 = vsel %vm99_vm4, %v93_v22, %v102_v28  ;;  %v262_v22 = vpop.permute.xlu2 %261  ;;  %vm334_vm4 = vcmask 244736  }
  0x94   :  { %v95_v24 = vpop.f32.mrf.mxu0 }
  0x95   :  { %v96_v26 = vadd.f32 %v95_v24, %v56_v18  ;;  %v244_v18 = vld [vmem:[%s608_s5 + $0x18] sm:$0x3f] }
  0x97   :  { %vm100_vm3 = vcmp.ge.f32.partialorder %v96_v26, 0.0  ;;  %v103_v27 = vmul.f32 0.1, %v96_v26  ;;  %v257_v23 = vpop.permute.xlu0 %256 }
  0x98   :  { %v252_v29 = vpop.permute.xlu1 %251 }
  0x99   :  { %v106_v30 = vsel %vm100_vm3, %v96_v26, %v103_v27 }
  0x9a   :  { %383 = vmatpush.msk.msra.mxu1 %vm178_vm2, %v106_v30  ;;  %398 = vmatpush.msk.msra.mxu3 %vm178_vm2, %v106_v30 }
  0x9c   :  { %196 = vmatpush.msra.mxu1 %v105_v32  ;;  %399 = vmatpush.msra.mxu3 %v105_v32 }
  0x9e   :  { %197 = vmatpush.msra.mxu1 %v104_v35  ;;  %400 = vmatpush.msra.mxu3 %v104_v35 }
  0x9f   :  { %384 = vmatmul.msk.f32.vlgmr.msra.gmra.mxu1 %vm156_vm6, %v107_v33  ;;  %388 = vmatmul.msk.f32.vlgmr.msra.gmra.mxu3 %vm156_vm6, %v111_v34 }
  0xa7   :  { %385 = vmatmul.msk.f32.gmra.mxu1 %vm156_vm6, %v108_v37  ;;  %389 = vmatmul.msk.f32.gmra.mxu3 %vm156_vm6, %v112_v38  ;;  %v326_v38 = vld [vmem:[%s610_s7] sm:$0x1] }
  0xaf   :  { %386 = vmatmul.msk.f32.gmra.mxu1 %vm156_vm6, %v109_v40  ;;  %390 = vmatmul.msk.f32.gmra.mxu3 %vm156_vm6, %v113_v41  ;;  %v331_v40 = vpop.permute.xlu2 %330 }
  0xb0   :  { %v333_v41 = vperm.slane %v331_v40, 0 }
  0xb7   :  { %387 = vmatmul.msk.f32.gmra.mxu1 %vm156_vm6, %v110_v43 }
 0x11c   :  { %v199_v44 = vpop.f32.mrf.mxu1 }
 0x11d   :  { %v200_v6 = vadd.f32 %v199_v44, %v124_v5 }
 0x11f   :  { %v227_v12 = vmul.f32 0.1, %v200_v6  ;;  %vm220_vm13 = vcmp.ge.f32.partialorder %v200_v6, 0.0 }
 0x121   :  { %v234_v16 = vsel %vm220_vm13, %v200_v6, %v227_v12 }
 0x122   :  { %v211_v45 = vpop.f32.mrf.mxu3 }
 0x123   :  { %v212_v55 = vadd.f32 %v211_v45, %v144_v51 }
 0x124   :  { %v202_v47 = vpop.f32.mrf.mxu1 }
 0x125   :  { %v231_v0 = vmul.f32 0.1, %v212_v55  ;;  %vm224_vm9 = vcmp.ge.f32.partialorder %v212_v55, 0.0  ;;  %v203_v2 = vadd.f32 %v202_v47, %v129_v1 }
 0x127   :  { %v238_v7 = vsel %vm224_vm9, %v212_v55, %v231_v0  ;;  %v228_v10 = vmul.f32 0.1, %v203_v2  ;;  %vm221_vm12 = vcmp.ge.f32.partialorder %v203_v2, 0.0 }
 0x129   :  { %v235_v13 = vsel %vm221_vm12, %v203_v2, %v228_v10 }
 0x12a   :  { %v214_v48 = vpop.f32.mrf.mxu3 }
 0x12b   :  { %v215_v53 = vadd.f32 %v214_v48, %v149_v46 }
 0x12c   :  { %v205_v50 = vpop.f32.mrf.mxu1 }
 0x12d   :  { %v232_v60 = vmul.f32 0.1, %v215_v53  ;;  %vm225_vm8 = vcmp.ge.f32.partialorder %v215_v53, 0.0  ;;  %v206_v62 = vadd.f32 %v205_v50, %v134_v61 }
 0x12f   :  { %v239_v3 = vsel %vm225_vm8, %v215_v53, %v232_v60  ;;  %v229_v8 = vmul.f32 0.1, %v206_v62  ;;  %vm222_vm11 = vcmp.ge.f32.partialorder %v206_v62, 0.0 }
 0x131   :  { %v236_v11 = vsel %vm222_vm11, %v206_v62, %v229_v8 }
 0x132   :  { %v217_v54 = vpop.f32.mrf.mxu3 }
 0x133   :  { %v218_v56 = vadd.f32 %v217_v54, %v154_v49 }
 0x134   :  { %v208_v57 = vpop.f32.mrf.mxu1 }
 0x135   :  { %v233_v58 = vmul.f32 0.1, %v218_v56  ;;  %v209_v59 = vadd.f32 %v208_v57, %v139_v52  ;;  %vm226_vm7 = vcmp.ge.f32.partialorder %v218_v56, 0.0 }
 0x137   :  { %v240_v63 = vsel %vm226_vm7, %v218_v56, %v233_v58  ;;  %v230_v4 = vmul.f32 0.1, %v209_v59  ;;  %vm223_vm10 = vcmp.ge.f32.partialorder %v209_v59, 0.0 }
 0x138   :  { %391 = vmatpush.msk.msrb.mxu0 %vm68_vm0, %v240_v63  ;;  %401 = vmatpush.msk.msra.mxu2 %vm68_vm0, %v240_v63 }
 0x139   :  { %v237_v9 = vsel %vm223_vm10, %v209_v59, %v230_v4 }
 0x13a   :  { %295 = vmatpush.msrb.mxu0 %v239_v3  ;;  %402 = vmatpush.msra.mxu2 %v239_v3 }
 0x13c   :  { %296 = vmatpush.msrb.mxu0 %v238_v7  ;;  %403 = vmatpush.msra.mxu2 %v238_v7 }
 0x13e   :  { %297 = vmatpush.msrb.mxu0 %v237_v9  ;;  %404 = vmatpush.msra.mxu2 %v237_v9 }
 0x140   :  { %298 = vmatpush.msrb.mxu0 %v236_v11  ;;  %405 = vmatpush.msra.mxu2 %v236_v11 }
 0x142   :  { %299 = vmatpush.msrb.mxu0 %v235_v13  ;;  %406 = vmatpush.msra.mxu2 %v235_v13 }
 0x144   :  { %300 = vmatpush.msrb.mxu0 %v234_v16  ;;  %407 = vmatpush.msra.mxu2 %v234_v16 }
 0x145   :  { %392 = vmatmul.msk.f32.vlgmr.msrb.gmra.mxu0 %vm269_vm14, %v241_v14  ;;  %393 = vmatmul.msk.f32.vlgmr.msra.gmra.mxu2 %vm269_vm14, %v242_v15 }
 0x14d   :  { %394 = vmatmul.msk.f32.gmra.mxu2 %vm269_vm14, %v243_v17 }
 0x155   :  { %395 = vmatmul.msk.f32.gmra.mxu2 %vm269_vm14, %v244_v18 }
 0x1c2   :  { %v302_v25 = vpop.f32.mrf.mxu0 }
 0x1c3   :  { %v303_v30 = vadd.f32 %v302_v25, %v252_v29 }
 0x1c5   :  { %v318_v36 = vmul.f32 0.1, %v303_v30  ;;  %vm314_vm3 = vcmp.ge.f32.partialorder %v303_v30, 0.0 }
 0x1c7   :  { %v322_v39 = vsel %vm314_vm3, %v303_v30, %v318_v36 }
 0x1c8   :  { %v305_v19 = vpop.f32.mrf.mxu2 }
 0x1c9   :  { %v306_v27 = vadd.f32 %v305_v19, %v257_v23 }
 0x1cb   :  { %v319_v34 = vmul.f32 0.1, %v306_v27  ;;  %vm315_vm2 = vcmp.ge.f32.partialorder %v306_v27, 0.0 }
 0x1cd   :  { %v323_v37 = vsel %vm315_vm2, %v306_v27, %v319_v34 }
 0x1d0   :  { %v308_v21 = vpop.f32.mrf.mxu2 }
 0x1d1   :  { %v309_v24 = vadd.f32 %v308_v21, %v262_v22 }
 0x1d3   :  { %v320_v32 = vmul.f32 0.1, %v309_v24  ;;  %vm316_vm1 = vcmp.ge.f32.partialorder %v309_v24, 0.0 }
 0x1d5   :  { %v324_v35 = vsel %vm316_vm1, %v309_v24, %v320_v32 }
 0x1d8   :  { %v311_v26 = vpop.f32.mrf.mxu2 }
 0x1d9   :  { %v312_v28 = vadd.f32 %v311_v26, %v267_v20 }
 0x1db   :  { %v321_v31 = vmul.f32 0.1, %v312_v28  ;;  %vm317_vm0 = vcmp.ge.f32.partialorder %v312_v28, 0.0 }
 0x1dd   :  { %v325_v33 = vsel %vm317_vm0, %v312_v28, %v321_v31 }
 0x1de   :  { %396 = vmatpush.msk.msrb.mxu3 %vm338_vm15, %v325_v33 }
 0x1e0   :  { %355 = vmatpush.msrb.mxu3 %v324_v35 }
 0x1e2   :  { %356 = vmatpush.msrb.mxu3 %v323_v37 }
 0x1e4   :  { %357 = vmatpush.msrb.mxu3 %v322_v39 }
 0x1e5   :  { %397 = vmatmul.msk.f32.vlgmr.msrb.gmra.mxu3 %vm334_vm4, %v326_v38 }
 0x268   :  { %v359_v42 = vpop.f32.mrf.mxu3 }
 0x269   :  { %v360_v43 = vadd.f32 %v359_v42, %v333_v41 }
 0x26b   :  { %362 = vst [vmem:[#allocation3] sm:$0x1] %v360_v43 }
 0x26c   :  { %373 = dma.vmem_to_hbm [thread:$0]  %s369_s19, 16, %s371_s22, [#allocation4]  }
 0x26d   :  { %437 = dma.done.wait [#allocation4], 16  }
 0x26e   :  { %438 = vsyncadd [#allocation4], 4294967280 }
 0x26f   :  { %378 = vsyncpa [#allocation4], 1 }

</bundles_post_ra>
